<compile_context>
chip_gen: v6e
topology: v6e:2x2x1
jax: 0.10.0
libtpu: 0.0.40
codegen_flags: <defaults>
</compile_context>

<pallas_src>
import functools

import jax
import jax.numpy as jnp
from jax.experimental import pallas as pl
from jax.experimental.pallas import tpu as pltpu


# ----------------------------------------------------------------------------
# Pallas kernel: one grid step == Bblk batch rows, fully fused forward pass.
# Everything is a plain 2-D matmul / elementwise op; no scratch, no loops.
# ----------------------------------------------------------------------------
def vae_kernel(x_ref, eps_ref,
               wenc_ref, benc_ref, wfc_ref, bfc_ref,
               wmu_ref, wlv_ref,
               wdl_ref, bdl_ref, wdc_ref, bdc_ref,
               xhat_ref, zms_ref):
    f32 = jnp.float32
    H = eps_ref.shape[1]

    x = x_ref[...]                                                # (Bblk, L*Cin)

    # ---------------- encoder ----------------
    # Conv1d(k=3, pad=1) as a single banded matmul on L-major-flattened rows.
    h1 = jnp.dot(x, wenc_ref[...], preferred_element_type=f32) + benc_ref[...]
    h1 = jnp.maximum(h1, 0.0)                                     # (Bblk, L*C1)
    # Flatten + Linear: one (Bblk, L*C1) @ (L*C1, D) matmul.
    h2 = jnp.dot(h1, wfc_ref[...], preferred_element_type=f32) + bfc_ref[...]
    h2 = jnp.maximum(h2, 0.0)                                     # (Bblk, D)

    mu = jnp.dot(h2, wmu_ref[...], preferred_element_type=f32)    # (Bblk, H)
    logvar = jnp.dot(h2, wlv_ref[...], preferred_element_type=f32)

    # ---------------- reparameterize ----------------
    std = jnp.exp(logvar * 0.5)
    z = mu + eps_ref[...] * std                                   # (Bblk, H)

    # ---------------- decoder ----------------
    # Linear(H -> L*C1) as one matmul; conv as one banded matmul.
    hd = jnp.dot(z, wdl_ref[...], preferred_element_type=f32) + bdl_ref[...]
    hd = jnp.maximum(hd, 0.0)                                     # (Bblk, L*C1)
    y = jnp.dot(hd, wdc_ref[...], preferred_element_type=f32) + bdc_ref[...]

    xhat_ref[...] = y                                             # (Bblk, L*Cin)
    # Pack [z | mu | std] into one lane-contiguous (Bblk, 3H) output block.
    zms_ref[:, 0:H] = z
    zms_ref[:, H:2 * H] = mu
    zms_ref[:, 2 * H:3 * H] = std


# ----------------------------------------------------------------------------
# Host-side parameter preparation (one-time): fold convs into banded matrices,
# flatten the fc weights, tile the conv biases.
# ----------------------------------------------------------------------------
def _conv_band_matrix(w, L):
    """Fold a k=3, pad=1 'same' Conv1d weight (3, Cin, Cout) into a banded
    (L*Cin, L*Cout) matrix so the conv becomes ONE matmul on L-major-flattened
    activations.  O(L^2) weight storage -- fine at L=16 (switch to pltpu.roll
    based shifts if L grows large)."""
    K, cin, cout = w.shape
    full = jnp.zeros((L, cin, L, cout), w.dtype)
    for k in range(K):
        lo = max(0, 1 - k)
        hi = min(L, L + 1 - k)
        l_out = jnp.arange(lo, hi)
        l_in = l_out + (k - 1)
        full = full.at[l_in, :, l_out, :].set(
            jnp.broadcast_to(w[k], (hi - lo, cin, cout)))
    return full.reshape(L * cin, L * cout)


def prepare_params(params, L):
    Cin = params["w1"].shape[1]
    C1 = params["w1"].shape[2]
    D = params["wfc3"].shape[2]
    H = params["wmu"].shape[1]
    return {
        "wenc": _conv_band_matrix(params["w1"], L),                # (L*Cin, L*C1)
        "benc": jnp.tile(params["b1"], (1, L)),                    # (1, L*C1)
        "wfc": params["wfc3"].reshape(L * C1, D),                  # (L*C1, D)
        "bfc": params["bfc"],                                      # (1, D)
        "wmu": params["wmu"],                                      # (D, H)
        "wlv": params["wlv"],                                      # (D, H)
        "wdl": jnp.transpose(params["wd3"], (1, 0, 2)).reshape(H, L * C1),
        "bdl": params["bd3"].reshape(1, L * C1),                   # (1, L*C1)
        "wdc": _conv_band_matrix(params["w2"], L),                 # (L*C1, L*Cin)
        "bdc": jnp.tile(params["b2"], (1, L)),                     # (1, L*Cin)
    }


def _pick_batch_block(B):
    # v7x has 2 TensorCores: keep >=2 grid steps when the batch is large enough
    # to split into sublane-aligned (multiple of 8) blocks.  Otherwise run the
    # whole batch in a single grid step (minimum per-step overhead; v5e/v6e
    # have a single TensorCore so there is nothing to shard across).
    if B >= 16:
        return max(8, ((B // 2) // 8) * 8)
    return B


# ----------------------------------------------------------------------------
# Wrapper: plain-JAX glue (transpose / flatten / batch padding) around the call.
# ----------------------------------------------------------------------------
@functools.partial(jax.jit, static_argnames=())
def vae_forward(x_ncl, eps_bh, kparams):
    """x_ncl: (B, Cin, L) like PyTorch NCL.  Returns (x_hat, z, mu, std)."""
    x_blc = jnp.transpose(x_ncl, (0, 2, 1)).astype(jnp.float32)    # (B, L, Cin)
    B, L, Cin = x_blc.shape
    LCin = L * Cin
    LC1 = kparams["wenc"].shape[1]
    D = kparams["wfc"].shape[1]
    H = kparams["wmu"].shape[1]

    Bblk = _pick_batch_block(B)
    n_steps = -(-B // Bblk)
    Bp = n_steps * Bblk

    x_flat = x_blc.reshape(B, LCin)
    eps = eps_bh.astype(jnp.float32)
    if Bp != B:
        x_flat = jnp.pad(x_flat, ((0, Bp - B), (0, 0)))
        eps = jnp.pad(eps, ((0, Bp - B), (0, 0)))

    flops = 2 * Bp * (LCin * LC1 + LC1 * D + 2 * D * H + H * LC1 + LC1 * LCin)
    bytes_accessed = 4 * (x_flat.size + eps.size
                          + sum(int(v.size) for v in kparams.values())
                          + Bp * LCin + Bp * 3 * H)

    grid_spec = pltpu.PrefetchScalarGridSpec(
        num_scalar_prefetch=0,
        grid=(n_steps,),
        in_specs=[
            pl.BlockSpec((Bblk, LCin), lambda i: (i, 0)),      # x (flattened)
            pl.BlockSpec((Bblk, H), lambda i: (i, 0)),         # eps
            pl.BlockSpec((LCin, LC1), lambda i: (0, 0)),       # enc conv (banded)
            pl.BlockSpec((1, LC1), lambda i: (0, 0)),          # enc conv bias (tiled)
            pl.BlockSpec((LC1, D), lambda i: (0, 0)),          # enc linear
            pl.BlockSpec((1, D), lambda i: (0, 0)),            # enc linear bias
            pl.BlockSpec((D, H), lambda i: (0, 0)),            # mu head (no bias)
            pl.BlockSpec((D, H), lambda i: (0, 0)),            # logvar head (no bias)
            pl.BlockSpec((H, LC1), lambda i: (0, 0)),          # dec linear
            pl.BlockSpec((1, LC1), lambda i: (0, 0)),          # dec linear bias
            pl.BlockSpec((LC1, LCin), lambda i: (0, 0)),       # dec conv (banded)
            pl.BlockSpec((1, LCin), lambda i: (0, 0)),         # dec conv bias (tiled)
        ],
        out_specs=[
            pl.BlockSpec((Bblk, LCin), lambda i: (i, 0)),      # x_hat (flattened)
            pl.BlockSpec((Bblk, 3 * H), lambda i: (i, 0)),     # [z | mu | std]
        ],
    )
    out_shape = (
        jax.ShapeDtypeStruct((Bp, LCin), jnp.float32),
        jax.ShapeDtypeStruct((Bp, 3 * H), jnp.float32),
    )
    xhat_flat, zms = pl.pallas_call(
        vae_kernel,
        out_shape=out_shape,
        grid_spec=grid_spec,
        compiler_params=pltpu.CompilerParams(
            dimension_semantics=("parallel",)),
        cost_estimate=pl.CostEstimate(
            flops=flops, transcendentals=Bp * H,
            bytes_accessed=bytes_accessed),
    )(x_flat, eps,
      kparams["wenc"], kparams["benc"], kparams["wfc"], kparams["bfc"],
      kparams["wmu"], kparams["wlv"],
      kparams["wdl"], kparams["bdl"], kparams["wdc"], kparams["bdc"])

    x_hat = jnp.transpose(xhat_flat[:B].reshape(B, L, Cin), (0, 2, 1))  # back to NCL
    z = zms[:B, 0:H]
    mu = zms[:B, H:2 * H]
    std = zms[:B, 2 * H:3 * H]
    return x_hat, z, mu, std


# ----------------------------------------------------------------------------
# Pure-JAX reference (same math, pad-based conv, original weight layout).
# ----------------------------------------------------------------------------
def vae_reference(x_ncl, eps_bh, params):
    x = jnp.transpose(x_ncl, (0, 2, 1)).astype(jnp.float32)          # (B, L, Cin)
    B, L, Cin = x.shape

    def conv(h, w, b):                                               # h (B,L,C)
        hp = jnp.pad(h, ((0, 0), (1, 1), (0, 0)))
        y = sum(jnp.einsum("blc,co->blo", hp[:, k:k + L, :], w[k]) for k in range(3))
        return y + b[None, :, :]

    h1 = jax.nn.relu(conv(x, params["w1"], params["b1"]))            # (B,L,C1)
    h2 = jax.nn.relu(jnp.einsum("blc,lcd->bd", h1, params["wfc3"]) + params["bfc"])
    mu = h2 @ params["wmu"]
    logvar = h2 @ params["wlv"]
    std = jnp.exp(logvar * 0.5)
    z = mu + eps_bh * std
    hd2 = jax.nn.relu(jnp.einsum("bh,lhc->blc", z, params["wd3"]) + params["bd3"][None])
    y = conv(hd2, params["w2"], params["b2"])
    return jnp.transpose(y, (0, 2, 1)), z, mu, std


# ----------------------------------------------------------------------------
if __name__ == "__main__":
    B, Cin, L = 2, 4, 16          # input x: (B, Cin, L)  (PyTorch NCL)
    C1 = 8                        # encoder conv channels
    D = 32                        # encoder.linear_dim
    H = 8                         # hidden_dim

    key = jax.random.PRNGKey(0)
    ks = jax.random.split(key, 12)

    def init(k, shape, fan_in):
        return (jax.random.normal(k, shape, jnp.float32) / jnp.sqrt(fan_in)).astype(jnp.float32)

    params = {
        "w1":   init(ks[0], (3, Cin, C1), 3 * Cin),     # enc Conv1d weight (k, cin, cout)
        "b1":   init(ks[1], (1, C1), C1),
        "wfc3": init(ks[2], (L, C1, D), L * C1),        # enc Linear (L-major flatten)
        "bfc":  init(ks[3], (1, D), D),
        "wmu":  init(ks[4], (D, H), D),                 # bias=False
        "wlv":  init(ks[5], (D, H), D),                 # bias=False
        "wd3":  init(ks[6], (L, H, C1), H),             # dec Linear (H -> L*C1)
        "bd3":  init(ks[7], (L, C1), C1),
        "w2":   init(ks[8], (3, C1, Cin), 3 * C1),      # dec Conv1d weight
        "b2":   init(ks[9], (1, Cin), Cin),
    }
    # log_scale = 0.0 parameter exists in the module but is unused in forward().

    x = jax.random.normal(ks[10], (B, Cin, L), jnp.float32)
    eps = jax.random.normal(ks[11], (B, H), jnp.float32)   # torch.randn_like(std)

    kparams = prepare_params(params, L)   # one-time host-side weight refactoring

    x_hat, z, mu, std = jax.block_until_ready(vae_forward(x, eps, kparams))
    x_hat_r, z_r, mu_r, std_r = vae_reference(x, eps, params)

    assert x_hat.shape == x.shape, (x_hat.shape, x.shape)
    for got, ref in ((x_hat, x_hat_r), (z, z_r), (mu, mu_r), (std, std_r)):
        assert jnp.allclose(got, ref, rtol=1e-4, atol=1e-4), \
            float(jnp.max(jnp.abs(got - ref)))

    print("KERNEL_OK")
</pallas_src>

<mosaic_0001>
module attributes {stable_mosaic.version = 11 : i64} {
  func.func @vae_kernel(%arg0: i32, %arg1: memref<2x64xf32, #tpu.memory_space<vmem>>, %arg2: memref<2x8xf32, #tpu.memory_space<vmem>>, %arg3: memref<64x128xf32, #tpu.memory_space<vmem>>, %arg4: memref<1x128xf32, #tpu.memory_space<vmem>>, %arg5: memref<128x32xf32, #tpu.memory_space<vmem>>, %arg6: memref<1x32xf32, #tpu.memory_space<vmem>>, %arg7: memref<32x8xf32, #tpu.memory_space<vmem>>, %arg8: memref<32x8xf32, #tpu.memory_space<vmem>>, %arg9: memref<8x128xf32, #tpu.memory_space<vmem>>, %arg10: memref<1x128xf32, #tpu.memory_space<vmem>>, %arg11: memref<128x64xf32, #tpu.memory_space<vmem>>, %arg12: memref<1x64xf32, #tpu.memory_space<vmem>>, %arg13: memref<2x64xf32, #tpu.memory_space<vmem>>, %arg14: memref<2x24xf32, #tpu.memory_space<vmem>>) attributes {dimension_semantics = [#tpu.dimension_semantics<parallel>], iteration_bounds = array<i64: 1>, scalar_prefetch = 0 : i64, scratch_operands = 0 : i64, tpu.core_type = #tpu.core_type<tc>, window_params = [{transform_indices = @transform_0, window_bounds = array<i64: 2, 64>}, {transform_indices = @transform_1, window_bounds = array<i64: 2, 8>}, {pipeline_mode = #tpu.pipeline_mode<synchronous>, transform_indices = @transform_2, window_bounds = array<i64: 64, 128>}, {pipeline_mode = #tpu.pipeline_mode<synchronous>, transform_indices = @transform_3, window_bounds = array<i64: 1, 128>}, {pipeline_mode = #tpu.pipeline_mode<synchronous>, transform_indices = @transform_4, window_bounds = array<i64: 128, 32>}, {pipeline_mode = #tpu.pipeline_mode<synchronous>, transform_indices = @transform_5, window_bounds = array<i64: 1, 32>}, {pipeline_mode = #tpu.pipeline_mode<synchronous>, transform_indices = @transform_6, window_bounds = array<i64: 32, 8>}, {pipeline_mode = #tpu.pipeline_mode<synchronous>, transform_indices = @transform_7, window_bounds = array<i64: 32, 8>}, {pipeline_mode = #tpu.pipeline_mode<synchronous>, transform_indices = @transform_8, window_bounds = array<i64: 8, 128>}, {pipeline_mode = #tpu.pipeline_mode<synchronous>, transform_indices = @transform_9, window_bounds = array<i64: 1, 128>}, {pipeline_mode = #tpu.pipeline_mode<synchronous>, transform_indices = @transform_10, window_bounds = array<i64: 128, 64>}, {pipeline_mode = #tpu.pipeline_mode<synchronous>, transform_indices = @transform_11, window_bounds = array<i64: 1, 64>}, {transform_indices = @transform_12, window_bounds = array<i64: 2, 64>}, {transform_indices = @transform_13, window_bounds = array<i64: 2, 24>}]} {
    %c0 = arith.constant 0 : index
    %c0_0 = arith.constant 0 : index
    %0 = vector.load %arg1[%c0, %c0_0] : memref<2x64xf32, #tpu.memory_space<vmem>>, vector<2x64xf32>
    %c0_1 = arith.constant 0 : index
    %c0_2 = arith.constant 0 : index
    %1 = vector.load %arg3[%c0_1, %c0_2] : memref<64x128xf32, #tpu.memory_space<vmem>>, vector<64x128xf32>
    %cst = arith.constant dense<0.000000e+00> : vector<2x128xf32>
    %2 = tpu.matmul %0, %1, %cst {dimension_numbers = #tpu.dot_dimension_numbers<[1], [0], [0], [1], [0, 0, 1, 1], [], []>} : vector<2x64xf32>, vector<64x128xf32>, vector<2x128xf32> -> vector<2x128xf32>
    %c0_3 = arith.constant 0 : index
    %c0_4 = arith.constant 0 : index
    %3 = vector.load %arg4[%c0_3, %c0_4] : memref<1x128xf32, #tpu.memory_space<vmem>>, vector<1x128xf32>
    %4 = vector.broadcast %3 : vector<1x128xf32> to vector<2x128xf32>
    %5 = arith.addf %2, %4 : vector<2x128xf32>
    %cst_5 = arith.constant 0.000000e+00 : f32
    %6 = vector.broadcast %cst_5 : f32 to vector<2x128xf32>
    %7 = arith.maximumf %5, %6 : vector<2x128xf32>
    %c0_6 = arith.constant 0 : index
    %c0_7 = arith.constant 0 : index
    %8 = vector.load %arg5[%c0_6, %c0_7] : memref<128x32xf32, #tpu.memory_space<vmem>>, vector<128x32xf32>
    %cst_8 = arith.constant dense<0.000000e+00> : vector<2x32xf32>
    %9 = tpu.matmul %7, %8, %cst_8 {dimension_numbers = #tpu.dot_dimension_numbers<[1], [0], [0], [1], [0, 0, 1, 1], [], []>} : vector<2x128xf32>, vector<128x32xf32>, vector<2x32xf32> -> vector<2x32xf32>
    %c0_9 = arith.constant 0 : index
    %c0_10 = arith.constant 0 : index
    %10 = vector.load %arg6[%c0_9, %c0_10] : memref<1x32xf32, #tpu.memory_space<vmem>>, vector<1x32xf32>
    %11 = vector.broadcast %10 : vector<1x32xf32> to vector<2x32xf32>
    %12 = arith.addf %9, %11 : vector<2x32xf32>
    %cst_11 = arith.constant 0.000000e+00 : f32
    %13 = vector.broadcast %cst_11 : f32 to vector<2x32xf32>
    %14 = arith.maximumf %12, %13 : vector<2x32xf32>
    %c0_12 = arith.constant 0 : index
    %c0_13 = arith.constant 0 : index
    %15 = vector.load %arg7[%c0_12, %c0_13] : memref<32x8xf32, #tpu.memory_space<vmem>>, vector<32x8xf32>
    %cst_14 = arith.constant dense<0.000000e+00> : vector<2x8xf32>
    %16 = tpu.matmul %14, %15, %cst_14 {dimension_numbers = #tpu.dot_dimension_numbers<[1], [0], [0], [1], [0, 0, 1, 1], [], []>} : vector<2x32xf32>, vector<32x8xf32>, vector<2x8xf32> -> vector<2x8xf32>
    %c0_15 = arith.constant 0 : index
    %c0_16 = arith.constant 0 : index
    %17 = vector.load %arg8[%c0_15, %c0_16] : memref<32x8xf32, #tpu.memory_space<vmem>>, vector<32x8xf32>
    %cst_17 = arith.constant dense<0.000000e+00> : vector<2x8xf32>
    %18 = tpu.matmul %14, %17, %cst_17 {dimension_numbers = #tpu.dot_dimension_numbers<[1], [0], [0], [1], [0, 0, 1, 1], [], []>} : vector<2x32xf32>, vector<32x8xf32>, vector<2x8xf32> -> vector<2x8xf32>
    %cst_18 = arith.constant 5.000000e-01 : f32
    %19 = vector.broadcast %cst_18 : f32 to vector<2x8xf32>
    %20 = arith.mulf %18, %19 : vector<2x8xf32>
    %21 = math.exp %20 : vector<2x8xf32>
    %c0_19 = arith.constant 0 : index
    %c0_20 = arith.constant 0 : index
    %22 = vector.load %arg2[%c0_19, %c0_20] : memref<2x8xf32, #tpu.memory_space<vmem>>, vector<2x8xf32>
    %23 = arith.mulf %22, %21 : vector<2x8xf32>
    %24 = arith.addf %16, %23 : vector<2x8xf32>
    %c0_21 = arith.constant 0 : index
    %c0_22 = arith.constant 0 : index
    %25 = vector.load %arg9[%c0_21, %c0_22] : memref<8x128xf32, #tpu.memory_space<vmem>>, vector<8x128xf32>
    %cst_23 = arith.constant dense<0.000000e+00> : vector<2x128xf32>
    %26 = tpu.matmul %24, %25, %cst_23 {dimension_numbers = #tpu.dot_dimension_numbers<[1], [0], [0], [1], [0, 0, 1, 1], [], []>} : vector<2x8xf32>, vector<8x128xf32>, vector<2x128xf32> -> vector<2x128xf32>
    %c0_24 = arith.constant 0 : index
    %c0_25 = arith.constant 0 : index
    %27 = vector.load %arg10[%c0_24, %c0_25] : memref<1x128xf32, #tpu.memory_space<vmem>>, vector<1x128xf32>
    %28 = vector.broadcast %27 : vector<1x128xf32> to vector<2x128xf32>
    %29 = arith.addf %26, %28 : vector<2x128xf32>
    %cst_26 = arith.constant 0.000000e+00 : f32
    %30 = vector.broadcast %cst_26 : f32 to vector<2x128xf32>
    %31 = arith.maximumf %29, %30 : vector<2x128xf32>
    %c0_27 = arith.constant 0 : index
    %c0_28 = arith.constant 0 : index
    %32 = vector.load %arg11[%c0_27, %c0_28] : memref<128x64xf32, #tpu.memory_space<vmem>>, vector<128x64xf32>
    %cst_29 = arith.constant dense<0.000000e+00> : vector<2x64xf32>
    %33 = tpu.matmul %31, %32, %cst_29 {dimension_numbers = #tpu.dot_dimension_numbers<[1], [0], [0], [1], [0, 0, 1, 1], [], []>} : vector<2x128xf32>, vector<128x64xf32>, vector<2x64xf32> -> vector<2x64xf32>
    %c0_30 = arith.constant 0 : index
    %c0_31 = arith.constant 0 : index
    %34 = vector.load %arg12[%c0_30, %c0_31] : memref<1x64xf32, #tpu.memory_space<vmem>>, vector<1x64xf32>
    %35 = vector.broadcast %34 : vector<1x64xf32> to vector<2x64xf32>
    %36 = arith.addf %33, %35 : vector<2x64xf32>
    %c0_32 = arith.constant 0 : index
    %c0_33 = arith.constant 0 : index
    %37 = vector.load %arg13[%c0_32, %c0_33] : memref<2x64xf32, #tpu.memory_space<vmem>>, vector<2x64xf32>
    tpu.vector_store %arg13[%c0_32, %c0_33], %36 {strides = array<i32>} : memref<2x64xf32, #tpu.memory_space<vmem>>, vector<2x64xf32>,
    %c0_34 = arith.constant 0 : index
    %c0_35 = arith.constant 0 : index
    %38 = vector.load %arg14[%c0_34, %c0_35] : memref<2x24xf32, #tpu.memory_space<vmem>>, vector<2x8xf32>
    tpu.vector_store %arg14[%c0_34, %c0_35], %24 {strides = array<i32>} : memref<2x24xf32, #tpu.memory_space<vmem>>, vector<2x8xf32>,
    %c0_36 = arith.constant 0 : index
    %c8 = arith.constant 8 : index
    %39 = vector.load %arg14[%c0_36, %c8] : memref<2x24xf32, #tpu.memory_space<vmem>>, vector<2x8xf32>
    tpu.vector_store %arg14[%c0_36, %c8], %16 {strides = array<i32>} : memref<2x24xf32, #tpu.memory_space<vmem>>, vector<2x8xf32>,
    %c0_37 = arith.constant 0 : index
    %c16 = arith.constant 16 : index
    %40 = vector.load %arg14[%c0_37, %c16] : memref<2x24xf32, #tpu.memory_space<vmem>>, vector<2x8xf32>
    tpu.vector_store %arg14[%c0_37, %c16], %21 {strides = array<i32>} : memref<2x24xf32, #tpu.memory_space<vmem>>, vector<2x8xf32>,
    return
  }
  func.func @transform_0(%arg0: i32) -> (i32, i32) {
    %c0_i32 = arith.constant 0 : i32
    %c0_i32_0 = arith.constant 0 : i32
    return %arg0, %c0_i32 : i32, i32
  }
  func.func @transform_1(%arg0: i32) -> (i32, i32) {
    %c0_i32 = arith.constant 0 : i32
    %c0_i32_0 = arith.constant 0 : i32
    return %arg0, %c0_i32 : i32, i32
  }
  func.func @transform_2(%arg0: i32) -> (i32, i32) {
    %c0_i32 = arith.constant 0 : i32
    %c0_i32_0 = arith.constant 0 : i32
    %c0_i32_1 = arith.constant 0 : i32
    return %c0_i32, %c0_i32_0 : i32, i32
  }
  func.func @transform_3(%arg0: i32) -> (i32, i32) {
    %c0_i32 = arith.constant 0 : i32
    %c0_i32_0 = arith.constant 0 : i32
    %c0_i32_1 = arith.constant 0 : i32
    return %c0_i32, %c0_i32_0 : i32, i32
  }
  func.func @transform_4(%arg0: i32) -> (i32, i32) {
    %c0_i32 = arith.constant 0 : i32
    %c0_i32_0 = arith.constant 0 : i32
    %c0_i32_1 = arith.constant 0 : i32
    return %c0_i32, %c0_i32_0 : i32, i32
  }
  func.func @transform_5(%arg0: i32) -> (i32, i32) {
    %c0_i32 = arith.constant 0 : i32
    %c0_i32_0 = arith.constant 0 : i32
    %c0_i32_1 = arith.constant 0 : i32
    return %c0_i32, %c0_i32_0 : i32, i32
  }
  func.func @transform_6(%arg0: i32) -> (i32, i32) {
    %c0_i32 = arith.constant 0 : i32
    %c0_i32_0 = arith.constant 0 : i32
    %c0_i32_1 = arith.constant 0 : i32
    return %c0_i32, %c0_i32_0 : i32, i32
  }
  func.func @transform_7(%arg0: i32) -> (i32, i32) {
    %c0_i32 = arith.constant 0 : i32
    %c0_i32_0 = arith.constant 0 : i32
    %c0_i32_1 = arith.constant 0 : i32
    return %c0_i32, %c0_i32_0 : i32, i32
  }
  func.func @transform_8(%arg0: i32) -> (i32, i32) {
    %c0_i32 = arith.constant 0 : i32
    %c0_i32_0 = arith.constant 0 : i32
    %c0_i32_1 = arith.constant 0 : i32
    return %c0_i32, %c0_i32_0 : i32, i32
  }
  func.func @transform_9(%arg0: i32) -> (i32, i32) {
    %c0_i32 = arith.constant 0 : i32
    %c0_i32_0 = arith.constant 0 : i32
    %c0_i32_1 = arith.constant 0 : i32
    return %c0_i32, %c0_i32_0 : i32, i32
  }
  func.func @transform_10(%arg0: i32) -> (i32, i32) {
    %c0_i32 = arith.constant 0 : i32
    %c0_i32_0 = arith.constant 0 : i32
    %c0_i32_1 = arith.constant 0 : i32
    return %c0_i32, %c0_i32_0 : i32, i32
  }
  func.func @transform_11(%arg0: i32) -> (i32, i32) {
    %c0_i32 = arith.constant 0 : i32
    %c0_i32_0 = arith.constant 0 : i32
    %c0_i32_1 = arith.constant 0 : i32
    return %c0_i32, %c0_i32_0 : i32, i32
  }
  func.func @transform_12(%arg0: i32) -> (i32, i32) {
    %c0_i32 = arith.constant 0 : i32
    %c0_i32_0 = arith.constant 0 : i32
    return %arg0, %c0_i32 : i32, i32
  }
  func.func @transform_13(%arg0: i32) -> (i32, i32) {
    %c0_i32 = arith.constant 0 : i32
    %c0_i32_0 = arith.constant 0 : i32
    return %arg0, %c0_i32 : i32, i32
  }
}

</mosaic_0001>

<bundles_post_ra>
// kernel: vae_forward.1
= control target key start
LH: loop header
LB: loop body
LE: loop exit
PB: predicated region body
PF: predicated region fallthrough
CT: control target
= control target key end

     0   :  { %v771_v0 = vmov 0.0   ;;  %vm772_vm0 = vmmov 0   ;;  %vm59_vm1 = vcmask 523264   ;;  %vm232_vm2 = vcmask 261120   ;;  %s773_s21 = smov 8   ;;  %s774_s15 = smov 16   ;;  %s1083_s2 = inlined_call_operand.vmem [shape: f32[64,128], index: 2, kind: input, shape index: {}]   ;;  %s1084_s4 = inlined_call_operand.vmem [shape: f32[128,32], index: 4, kind: input, shape index: {}]   ;;  %s1085_s0 = inlined_call_operand.vmem [shape: f32[2,64], index: 0, kind: input, shape index: {}]   ;;  %s1086_s6 = inlined_call_operand.vmem [shape: f32[32,8], index: 6, kind: input, shape index: {}]   ;;  %s1087_s3 = inlined_call_operand.vmem [shape: f32[1,128], index: 3, kind: input, shape index: {}]   ;;  %s1088_s5 = inlined_call_operand.vmem [shape: f32[1,32], index: 5, kind: input, shape index: {}]   ;;  %s1089_s7 = inlined_call_operand.vmem [shape: f32[32,8], index: 7, kind: input, shape index: {}]   ;;  %s1090_s8 = inlined_call_operand.vmem [shape: f32[8,128], index: 8, kind: input, shape index: {}]   ;;  %s1091_s10 = inlined_call_operand.vmem [shape: f32[128,64], index: 10, kind: input, shape index: {}]   ;;  %s1092_s1 = inlined_call_operand.vmem [shape: f32[2,8], index: 1, kind: input, shape index: {}]   ;;  %s1093_s13 = inlined_call_operand.vmem [shape: f32[2,24], index: 13, kind: output, shape index: {1}]   ;;  %s1094_s9 = inlined_call_operand.vmem [shape: f32[1,128], index: 9, kind: input, shape index: {}]   ;;  %s1095_s11 = inlined_call_operand.vmem [shape: f32[1,64], index: 11, kind: input, shape index: {}]   ;;  %s1096_s12 = inlined_call_operand.vmem [shape: f32[2,64], index: 12, kind: output, shape index: {0}]  }
   0x1   :  { %649 = vmatprep.subr.mxu0 %v771_v0  ;;  %v51_v1 = vld [vmem:[%s1083_s2 + $0x38] sm:$0xff]  ;;  %v50_v2 = vld [vmem:[%s1083_s2 + $0x30] sm:$0xff]  ;;  %665 = vmatprep.mubr.msk.f32.mxu0 %vm772_vm0, %v771_v0  ;;  %v49_v3 = vld [vmem:[%s1083_s2 + $0x28] sm:$0xff]  ;;  %vm394_vm3 = vcmask 64512   ;;  %vm564_vm4 = vcmask 58368   ;;  %vm570_vm5 = vcmask 123968  }
   0x2   :  { %650 = vmatpush3.msra.mxu0 %v51_v1  ;;  %668 = vmatprep.subr.mxu1 %v771_v0  ;;  %v149_v4 = vld [vmem:[%s1084_s4 + $0x78] sm:$0xff]  ;;  %v148_v5 = vld [vmem:[%s1084_s4 + $0x70] sm:$0xff]  ;;  %v48_v6 = vld [vmem:[%s1083_s2 + $0x20] sm:$0xff]  ;;  %vm576_vm6 = vcmask 189568   ;;  %vm562_vm7 = vcmask 517120  }
   0x3   :  { %651 = vmatprep.subr.mxu0 %v771_v0  ;;  %700 = vmatprep.mubr.msk.f32.mxu1 %vm772_vm0, %v771_v0  ;;  %v147_v7 = vld [vmem:[%s1084_s4 + $0x68] sm:$0xff]  ;;  %v47_v8 = vld [vmem:[%s1083_s2 + $0x18] sm:$0xff]  ;;  %v146_v9 = vld [vmem:[%s1084_s4 + $0x60] sm:$0xff] }
   0x4   :  { %652 = vmatpush3.msra.mxu0 %v50_v2  ;;  %669 = vmatpush3.msra.mxu1 %v149_v4  ;;  %v46_v10 = vld [vmem:[%s1083_s2 + $0x10] sm:$0xff]  ;;  %v145_v11 = vld [vmem:[%s1084_s4 + $0x58] sm:$0xff]  ;;  %v45_v12 = vld [vmem:[%s1083_s2 + $0x8] sm:$0xff] }
   0x5   :  { %653 = vmatprep.subr.mxu0 %v771_v0  ;;  %670 = vmatprep.subr.mxu1 %v771_v0  ;;  %v144_v13 = vld [vmem:[%s1084_s4 + $0x50] sm:$0xff]  ;;  %v44_v14 = vld [vmem:[%s1083_s2] sm:$0xff]  ;;  %v143_v16 = vld [vmem:[%s1084_s4 + $0x48] sm:$0xff] }
   0x6   :  { %654 = vmatpush3.msra.mxu0 %v49_v3  ;;  %671 = vmatpush3.msra.mxu1 %v148_v5  ;;  %v43_v15 = vld [vmem:[%s1085_s0] sm:$0x3]  ;;  %v141_v18 = vld [vmem:[%s1084_s4 + $0x38] sm:$0xff]  ;;  %v140_v19 = vld [vmem:[%s1084_s4 + $0x30] sm:$0xff] }
   0x7   :  { %655 = vmatprep.subr.mxu0 %v771_v0  ;;  %672 = vmatprep.subr.mxu1 %v771_v0  ;;  %v142_v17 = vld [vmem:[%s1084_s4 + $0x40] sm:$0xff]  ;;  %v139_v20 = vld [vmem:[%s1084_s4 + $0x28] sm:$0xff]  ;;  %v137_v22 = vld [vmem:[%s1084_s4 + $0x18] sm:$0xff] }
   0x8   :  { %656 = vmatpush3.msra.mxu0 %v48_v6  ;;  %673 = vmatpush3.msra.mxu1 %v147_v7  ;;  %v138_v21 = vld [vmem:[%s1084_s4 + $0x20] sm:$0xff]  ;;  %v136_v23 = vld [vmem:[%s1084_s4 + $0x10] sm:$0xff]  ;;  %v135_v24 = vld [vmem:[%s1084_s4 + $0x8] sm:$0xff] }
   0x9   :  { %657 = vmatprep.subr.mxu0 %v771_v0  ;;  %674 = vmatprep.subr.mxu1 %v771_v0  ;;  %v134_v25 = vld [vmem:[%s1084_s4] sm:$0xff]  ;;  %v231_v26 = vld [vmem:[%s1086_s6 + $0x18] sm:$0xff]  ;;  %v230_v27 = vld [vmem:[%s1086_s6 + $0x10] sm:$0xff] }
   0xa   :  { %658 = vmatpush3.msra.mxu0 %v47_v8  ;;  %675 = vmatpush3.msra.mxu1 %v146_v9  ;;  %v586_v28 = vld [vmem:[%s1087_s3] ss:$0 sm:$0xff]  ;;  %v229_v33 = vld [vmem:[%s1086_s6 + $0x8] sm:$0xff]  ;;  %v309_v40 = vld [vmem:[%s1089_s7 + $0x18] sm:$0xff] }
   0xb   :  { %659 = vmatprep.subr.mxu0 %v771_v0  ;;  %676 = vmatprep.subr.mxu1 %v771_v0  ;;  %v228_v34 = vld [vmem:[%s1086_s6] sm:$0xff]  ;;  %v308_v41 = vld [vmem:[%s1089_s7 + $0x10] sm:$0xff]  ;;  %v307_v42 = vld [vmem:[%s1089_s7 + $0x8] sm:$0xff] }
   0xc   :  { %660 = vmatpush3.msra.mxu0 %v46_v10  ;;  %677 = vmatpush3.msra.mxu1 %v145_v11  ;;  %v588_v35 = vld [vmem:[%s1088_s5] ss:$0 sm:$0xff]  ;;  %v484_v51 = vld [vmem:[%s1091_s10 + $0x78] sm:$0xff]  ;;  %v483_v52 = vld [vmem:[%s1091_s10 + $0x70] sm:$0xff] }
   0xd   :  { %661 = vmatprep.subr.mxu0 %v771_v0  ;;  %678 = vmatprep.subr.mxu1 %v771_v0  ;;  %v306_v43 = vld [vmem:[%s1089_s7] sm:$0xff]  ;;  %v482_v53 = vld [vmem:[%s1091_s10 + $0x68] sm:$0xff]  ;;  %v480_v55 = vld [vmem:[%s1091_s10 + $0x58] sm:$0xff] }
   0xe   :  { %662 = vmatpush3.msra.mxu0 %v45_v12  ;;  %679 = vmatpush3.msra.mxu1 %v144_v13  ;;  %v386_v44 = vld [vmem:[%s1090_s8] sm:$0xff]  ;;  %v479_v56 = vld [vmem:[%s1091_s10 + $0x50] sm:$0xff]  ;;  %v478_v58 = vld [vmem:[%s1091_s10 + $0x48] sm:$0xff] }
   0xf   :  { %663 = vmatprep.subr.mxu0 %v771_v0  ;;  %680 = vmatprep.subr.mxu1 %v771_v0  ;;  %v481_v54 = vld [vmem:[%s1091_s10 + $0x60] sm:$0xff]  ;;  %v476_v63 = vld [vmem:[%s1091_s10 + $0x38] sm:$0xff]  ;;  %v475_v1 = vld [vmem:[%s1091_s10 + $0x30] sm:$0xff] }
  0x10   :  { %664 = vmatpush3.msra.mxu0 %v44_v14  ;;  %681 = vmatpush3.msra.mxu1 %v143_v16  ;;  %v383_v57 = vld [vmem:[%s1092_s1] sm:$0x3]  ;;  %v474_v2 = vld [vmem:[%s1091_s10 + $0x28] sm:$0xff]  ;;  %v472_v4 = vld [vmem:[%s1091_s10 + $0x18] sm:$0xff] }
  0x11   :  { %666 = vmatmul.mubr.msk.f32.vlgmr.msra.gmra.mxu0 %vm59_vm1, %v43_v15  ;;  %682 = vmatprep.subr.mxu1 %v771_v0  ;;  %v477_v61 = vld [vmem:[%s1091_s10 + $0x40] sm:$0xff]  ;;  %v471_v5 = vld [vmem:[%s1091_s10 + $0x10] sm:$0xff]  ;;  %v470_v6 = vld [vmem:[%s1091_s10 + $0x8] sm:$0xff] }
  0x12   :  { %703 = vmatprep.subr.mxu0 %v771_v0  ;;  %683 = vmatpush3.msra.mxu1 %v142_v17  ;;  %v473_v3 = vld [vmem:[%s1091_s10 + $0x20] sm:$0xff] }
  0x13   :  { %711 = vmatprep.mubr.msk.f32.mxu0 %vm772_vm0, %v771_v0  ;;  %684 = vmatprep.subr.mxu1 %v771_v0  ;;  %v469_v7 = vld [vmem:[%s1091_s10] sm:$0xff] }
  0x14   :  { %685 = vmatpush3.msra.mxu1 %v141_v18  ;;  %704 = vmatpush3.msra.mxu0 %v231_v26  ;;  %v593_v14 = vld [vmem:[%s1095_s11] ss:$0 sm:$0xff] }
  0x15   :  { %686 = vmatprep.subr.mxu1 %v771_v0  ;;  %705 = vmatprep.subr.mxu0 %v771_v0 }
  0x16   :  { %687 = vmatpush3.msra.mxu1 %v140_v19  ;;  %706 = vmatpush3.msra.mxu0 %v230_v27 }
  0x17   :  { %688 = vmatprep.subr.mxu1 %v771_v0  ;;  %707 = vmatprep.subr.mxu0 %v771_v0 }
  0x18   :  { %689 = vmatpush3.msra.mxu1 %v139_v20  ;;  %708 = vmatpush3.msra.mxu0 %v229_v33 }
  0x19   :  { %690 = vmatprep.subr.mxu1 %v771_v0  ;;  %709 = vmatprep.subr.mxu0 %v771_v0 }
  0x1a   :  { %691 = vmatpush3.msra.mxu1 %v138_v21  ;;  %710 = vmatpush3.msra.mxu0 %v228_v34 }
  0x1b   :  { %692 = vmatprep.subr.mxu1 %v771_v0  ;;  %714 = vmatprep.subr.mxu0 %v771_v0 }
  0x1c   :  { %693 = vmatpush3.msra.mxu1 %v137_v22 }
  0x1d   :  { %694 = vmatprep.subr.mxu1 %v771_v0 }
  0x1e   :  { %695 = vmatpush3.msra.mxu1 %v136_v23 }
  0x1f   :  { %696 = vmatprep.subr.mxu1 %v771_v0 }
  0x20   :  { %697 = vmatpush3.msra.mxu1 %v135_v24 }
  0x21   :  { %698 = vmatprep.subr.mxu1 %v771_v0 }
  0x22   :  { %699 = vmatpush3.msra.mxu1 %v134_v25 }
  0x23   :  { %730 = vmatprep.subr.mxu1 %v771_v0 }
  0xd1   :  { %v129_v29 = vpop.f32.mrf.mxu0 }
  0xd2   :  { %v130_v30 = vadd.f32 %v586_v28, %v129_v29 }
  0xd3   :  { %v667_v31 = vpop.f32.mrf.mxu0 }
  0xd4   :  { %v133_v32 = vmax.f32 %v130_v30, 0.0 }
  0xd6   :  { %701 = vmatmul.mubr.f32.vlgmr.msra.gmra.mxu1 %v133_v32 }
  0xd7   :  { %762 = vmatprep.mubr.msk.f32.mxu1 %vm772_vm0, %v771_v0  ;;  %731 = vmatpush3.msra.mxu1 %v484_v51 }
  0xd8   :  { %732 = vmatprep.subr.mxu1 %v771_v0 }
  0xd9   :  { %733 = vmatpush3.msra.mxu1 %v483_v52 }
  0xda   :  { %734 = vmatprep.subr.mxu1 %v771_v0 }
  0xdb   :  { %735 = vmatpush3.msra.mxu1 %v482_v53 }
  0xdc   :  { %736 = vmatprep.subr.mxu1 %v771_v0 }
  0xdd   :  { %737 = vmatpush3.msra.mxu1 %v481_v54 }
  0xde   :  { %738 = vmatprep.subr.mxu1 %v771_v0 }
  0xdf   :  { %739 = vmatpush3.msra.mxu1 %v480_v55 }
  0xe0   :  { %740 = vmatprep.subr.mxu1 %v771_v0 }
  0xe1   :  { %741 = vmatpush3.msra.mxu1 %v479_v56 }
  0xe2   :  { %742 = vmatprep.subr.mxu1 %v771_v0 }
  0xe3   :  { %743 = vmatpush3.msra.mxu1 %v478_v58 }
  0xe4   :  { %744 = vmatprep.subr.mxu1 %v771_v0 }
  0xe5   :  { %745 = vmatpush3.msra.mxu1 %v477_v61 }
  0xe6   :  { %746 = vmatprep.subr.mxu1 %v771_v0 }
  0xe7   :  { %747 = vmatpush3.msra.mxu1 %v476_v63 }
  0xe8   :  { %748 = vmatprep.subr.mxu1 %v771_v0 }
  0xe9   :  { %749 = vmatpush3.msra.mxu1 %v475_v1 }
  0xea   :  { %750 = vmatprep.subr.mxu1 %v771_v0 }
  0xeb   :  { %751 = vmatpush3.msra.mxu1 %v474_v2 }
  0xec   :  { %752 = vmatprep.subr.mxu1 %v771_v0 }
  0xed   :  { %753 = vmatpush3.msra.mxu1 %v473_v3 }
  0xee   :  { %754 = vmatprep.subr.mxu1 %v771_v0 }
  0xef   :  { %755 = vmatpush3.msra.mxu1 %v472_v4 }
  0xf0   :  { %756 = vmatprep.subr.mxu1 %v771_v0 }
  0xf1   :  { %757 = vmatpush3.msra.mxu1 %v471_v5 }
  0xf2   :  { %758 = vmatprep.subr.mxu1 %v771_v0 }
  0xf3   :  { %759 = vmatpush3.msra.mxu1 %v470_v6 }
  0xf4   :  { %760 = vmatprep.subr.mxu1 %v771_v0 }
  0xf5   :  { %761 = vmatpush3.msra.mxu1 %v469_v7 }
 0x196   :  { %v223_v36 = vpop.f32.mrf.mxu1 }
 0x197   :  { %v224_v37 = vadd.f32 %v588_v35, %v223_v36 }
 0x198   :  { %v702_v38 = vpop.f32.mrf.mxu1 }
 0x199   :  { %v227_v39 = vmax.f32 %v224_v37, 0.0 }
 0x19b   :  { %712 = vmatmul.mubr.msk.f32.vlgmr.msra.gmra.mxu0 %vm232_vm2, %v227_v39 }
 0x19c   :  { %715 = vmatpush3.msra.mxu0 %v309_v40  ;;  %722 = vmatprep.mubr.msk.f32.mxu0 %vm772_vm0, %v771_v0 }
 0x19d   :  { %716 = vmatprep.subr.mxu0 %v771_v0 }
 0x19e   :  { %717 = vmatpush3.msra.mxu0 %v308_v41 }
 0x19f   :  { %718 = vmatprep.subr.mxu0 %v771_v0 }
 0x1a0   :  { %719 = vmatpush3.msra.mxu0 %v307_v42 }
 0x1a1   :  { %720 = vmatprep.subr.mxu0 %v771_v0 }
 0x1a2   :  { %721 = vmatpush3.msra.mxu0 %v306_v43 }
 0x1a3   :  { %723 = vmatmul.mubr.msk.f32.vlgmr.msra.gmra.mxu0 %vm232_vm2, %v227_v39  ;;  %725 = vmatprep.subr.mxu0 %v771_v0 }
 0x1a4   :  { %727 = vmatprep.mubr.msk.f32.mxu0 %vm772_vm0, %v771_v0  ;;  %726 = vmatpush3.msra.mxu0 %v386_v44  ;;  %v591_v0 = vld [vmem:[%s1094_s9] ss:$0 sm:$0xff] }
 0x25b   :  { %v302_v45 = vpop.f32.mrf.mxu0 }
 0x25c   :  { %567 = vrot.lane.b32.xlu0 %v302_v45, %s773_s21 }
 0x25d   :  { %v713_v46 = vpop.f32.mrf.mxu0 }
 0x263   :  { %v376_v47 = vpop.f32.mrf.mxu0 }
 0x264   :  { %v380_v48 = vmul.f32 0.5, %v376_v47 }
 0x265   :  { %v724_v49 = vpop.f32.mrf.mxu0 }
 0x266   :  { %v381_v50 = vmul.f32 1.442695, %v380_v48 }
 0x268   :  { %769 = vpow2.f32 %v381_v50 }
 0x275   :  { %v770_v59 = vpop.eup %769 }
 0x276   :  { %573 = vrot.lane.b32.xlu0 %v770_v59, %s774_s15  ;;  %v384_v60 = vmul.f32 %v770_v59, %v383_v57 }
 0x278   :  { %v385_v62 = vadd.f32 %v384_v60, %v302_v45 }
 0x27a   :  { %728 = vmatmul.mubr.msk.f32.vlgmr.msra.gmra.mxu0 %vm394_vm3, %v385_v62  ;;  %565 = vst.msk [vmem:[%s1093_s13] sm:$0x3] %vm564_vm4, %v385_v62 }
 0x2ce   :  { %v568_v8 = vpop.permute.xlu0 %567 }
 0x2cf   :  { %571 = vst.msk [vmem:[%s1093_s13] sm:$0x3] %vm570_vm5, %v568_v8 }
 0x2e8   :  { %v574_v9 = vpop.permute.xlu0 %573 }
 0x2e9   :  { %577 = vst.msk [vmem:[%s1093_s13] sm:$0x3] %vm576_vm6, %v574_v9 }
 0x33a   :  { %v464_v10 = vpop.f32.mrf.mxu0 }
 0x33b   :  { %v465_v11 = vadd.f32 %v591_v0, %v464_v10 }
 0x33c   :  { %v729_v12 = vpop.f32.mrf.mxu0 }
 0x33d   :  { %v468_v13 = vmax.f32 %v465_v11, 0.0 }
 0x33f   :  { %763 = vmatmul.mubr.f32.vlgmr.msra.gmra.mxu1 %v468_v13 }
 0x3ff   :  { %v558_v15 = vpop.f32.mrf.mxu1 }
 0x400   :  { %v559_v16 = vadd.f32 %v593_v14, %v558_v15 }
 0x401   :  { %v764_v17 = vpop.f32.mrf.mxu1 }
 0x402   :  { %563 = vst.msk [vmem:[%s1096_s12] sm:$0x3] %vm562_vm7, %v559_v16 }

</bundles_post_ra>
